<compile_context>
chip_gen: v5e
topology: v5e:2x2
jax: 0.10.0
libtpu: 0.0.40
codegen_flags: <defaults>
</compile_context>

<pallas_src>
from functools import partial

import numpy as np
import jax
import jax.numpy as jnp
from jax.experimental import pallas as pl
from jax.experimental.pallas import tpu as pltpu


def _round_up(x, m):
    return ((x + m - 1) // m) * m


# ---------------------------------------------------------------------------
# Kernel
# ---------------------------------------------------------------------------
def _s4_kernel(s_ref, e_ref, out_ref):
    # s_ref  : (2, TH, N2)      complex scale for this (H-tile, L-tile) [re, im]
    # e_ref  : (2, TH, N2, TL)  base table exp(dtA * l_local)           [re, im]
    # out_ref: (TH, TL)
    TL = out_ref.shape[-1]
    CH = 256 if TL % 256 == 0 else 128        # lane-dense sub-chunk (vreg-sized)
    n_chunks = TL // CH

    # Hoisted once per grid step: tiny (TH, N2, 1) values, N2 in sublanes.
    s_re = s_ref[0][:, :, None]
    s_im = s_ref[1][:, :, None]

    def body(c, carry):
        off = pl.multiple_of(c * CH, CH)
        er = e_ref[0, :, :, pl.ds(off, CH)]   # (TH, N2, CH)
        ei = e_ref[1, :, :, pl.ds(off, CH)]
        # Re(S * E): 3 VPU ops/element, then sublane (XLU) reduce over N2.
        out_ref[:, pl.ds(off, CH)] = jnp.sum(s_re * er - s_im * ei, axis=1)
        return carry

    jax.lax.fori_loop(0, n_chunks, body, 0, unroll=True)


def _e_block_spec(TH, N2, TL, single_buffer):
    imap = lambda i, j: (0, i, 0, 0)          # resident across the L grid axis
    if single_buffer and hasattr(pl, "Buffered"):
        try:
            return pl.BlockSpec((2, TH, N2, TL), imap,
                                pipeline_mode=pl.Buffered(1))
        except TypeError:                     # older Pallas: no pipeline_mode
            pass
    return pl.BlockSpec((2, TH, N2, TL), imap)


# ---------------------------------------------------------------------------
# Jitted precompute + pallas_call (fused into few HBM passes by XLA)
# ---------------------------------------------------------------------------
@partial(jax.jit, static_argnames=("L", "TH", "TL", "vmem_limit", "e_single_buf"))
def _s4_conv_impl(log_dt, C_re, C_im, log_A_re, A_im,
                  L, TH, TL, vmem_limit, e_single_buf):
    H, N2 = C_re.shape
    Hp = _round_up(H, TH)
    Lp = _round_up(L, TL)
    nH, nL = Hp // TH, Lp // TL

    # ---- tiny (H, N2) parameter math (complex), pad H before the L-broadcast
    dt = jnp.exp(log_dt.astype(jnp.float32))
    A = (-jnp.exp(log_A_re.astype(jnp.float32))).astype(jnp.complex64) \
        + 1j * A_im.astype(jnp.complex64)
    C = C_re.astype(jnp.complex64) + 1j * C_im.astype(jnp.complex64)
    dtA = A * dt[:, None].astype(jnp.complex64)
    Cp = C * (jnp.exp(dtA) - 1.0) / A                      # discretized C

    dtA_re = jnp.real(dtA).astype(jnp.float32)
    dtA_im = jnp.imag(dtA).astype(jnp.float32)
    c2_re = (2.0 * jnp.real(Cp)).astype(jnp.float32)       # fold the final 2x
    c2_im = (2.0 * jnp.imag(Cp)).astype(jnp.float32)

    if Hp != H:                                            # padded rows: scale 0
        pad = ((0, Hp - H), (0, 0))
        dtA_re = jnp.pad(dtA_re, pad)
        dtA_im = jnp.pad(dtA_im, pad)
        c2_re = jnp.pad(c2_re, pad)
        c2_im = jnp.pad(c2_im, pad)

    # ---- base table E[{re,im}, h, n, l_local] = exp(dtA * l_local) ---------
    l_loc = jnp.arange(TL, dtype=jnp.float32)
    mag = jnp.exp(dtA_re[:, :, None] * l_loc)              # dtA_re <= 0
    ph = dtA_im[:, :, None] * l_loc
    E = jnp.stack([mag * jnp.cos(ph), mag * jnp.sin(ph)], axis=0)  # (2,Hp,N2,TL)

    # ---- per-L-tile scale S[j,{re,im},h,n] = 2*C' * exp(dtA * j*TL) --------
    # j*TL is exact in f32 for L < 2^24; the phase is range-reduced mod 2*pi
    # so large-L tiles do not lose phase accuracy.
    l0 = jnp.arange(nL, dtype=jnp.float32) * np.float32(TL)        # (nL,)
    ph0 = dtA_im[None] * l0[:, None, None]                         # (nL,Hp,N2)
    two_pi = np.float32(2.0 * np.pi)
    ph0 = ph0 - two_pi * jnp.round(ph0 / two_pi)
    mag0 = jnp.exp(dtA_re[None] * l0[:, None, None])
    cos0, sin0 = jnp.cos(ph0), jnp.sin(ph0)
    S = jnp.stack([mag0 * (c2_re * cos0 - c2_im * sin0),
                   mag0 * (c2_re * sin0 + c2_im * cos0)], axis=1)  # (nL,2,Hp,N2)

    out_p = pl.pallas_call(
        _s4_kernel,
        out_shape=jax.ShapeDtypeStruct((Hp, Lp), jnp.float32),
        grid_spec=pltpu.PrefetchScalarGridSpec(
            num_scalar_prefetch=0,
            grid=(nH, nL),
            in_specs=[
                pl.BlockSpec((None, 2, TH, N2), lambda i, j: (j, 0, i, 0)),
                _e_block_spec(TH, N2, TL, e_single_buf),
            ],
            out_specs=pl.BlockSpec((TH, TL), lambda i, j: (i, j)),
        ),
        compiler_params=pltpu.CompilerParams(
            dimension_semantics=("parallel", "parallel"),
            vmem_limit_bytes=int(vmem_limit),
        ),
    )(S, E)

    if Hp == H and Lp == L:
        return out_p                      # no padding -> no extra slice copy
    return out_p[:H, :L]


# ---------------------------------------------------------------------------
# Generation-aware tile selection
# ---------------------------------------------------------------------------
def _tpu_generation():
    try:
        kind = (jax.devices()[0].device_kind or "").lower()
    except Exception:
        return "unknown"
    if "v5 lite" in kind or "v5e" in kind or "v5lite" in kind:
        return "v5e"
    if "v6" in kind:
        return "v6e"
    if "v7" in kind or "7x" in kind or "tpu7" in kind:
        return "v7x"
    return "unknown"


_GEN_CFG = {
    # (vmem_cap_bytes, tl_cap, th_cap)
    "v7x": (44 * 2**20, 2048, 256),    # 64 MiB physical: leave scratch headroom
    "v6e": (100 * 2**20, 2048, 256),   # 128 MiB physical
    "v5e": (96 * 2**20, 1024, 256),    # 128 MiB physical, 1 vst slot
    "unknown": (44 * 2**20, 1024, 128),
}


def _choose_tiles(H, N2, L, gen, TH=None, TL=None):
    vmem_cap, tl_cap, th_cap = _GEN_CFG.get(gen, _GEN_CFG["unknown"])
    budget = int(0.55 * vmem_cap)      # headroom for compiler scratch / temps

    L128 = _round_up(max(L, 1), 128)
    if TL is None:
        TL = min(tl_cap, L128)
        while TL > 128 and L128 % TL != 0:   # prefer a divisor of padded L
            TL -= 128

    def nbytes(th, tl, e_bufs):
        return 4 * (e_bufs * 2 * th * N2 * tl      # E table
                    + 2 * th * tl                  # out (double-buffered)
                    + 2 * 2 * th * N2              # S (double-buffered)
                    + 2 * th * N2 * min(256, tl))  # in-kernel chunk headroom

    def l_tiles(tl):
        return _round_up(L, tl) // tl

    nL = l_tiles(TL)
    e_single_buf = nL >= 4             # single-buffer E only if stall amortizes
    e_bufs = 1 if e_single_buf else 2

    if TH is None:
        while TL > 128 and nbytes(8, TL, e_bufs) > budget:
            TL = max(128, (TL // 2) // 128 * 128)
            nL = l_tiles(TL)
            e_single_buf = nL >= 4
            e_bufs = 1 if e_single_buf else 2
        Hp8 = _round_up(max(H, 1), 8)
        th_max = min(th_cap, Hp8)
        if nL == 1 and Hp8 >= 16:      # keep >=2 grid blocks for megacore
            th_max = min(th_max, max(8, (Hp8 // 2) // 8 * 8))
        TH = 8
        for cand in range(th_max, 7, -8):
            if Hp8 % cand == 0 and nbytes(cand, TL, e_bufs) <= budget:
                TH = cand
                break

    assert TH % 8 == 0 and TL % 128 == 0
    return int(TH), int(TL), int(vmem_cap), bool(e_single_buf)


def s4_conv_kernel(log_dt, C_re, C_im, log_A_re, A_im, L, *, TH=None, TL=None):
    """Returns the S4D convolution kernel of shape (H, L), float32."""
    H, N2 = C_re.shape
    gen = _tpu_generation()
    TH, TL, vmem_limit, e_single_buf = _choose_tiles(H, N2, int(L), gen, TH, TL)
    return _s4_conv_impl(log_dt, C_re, C_im, log_A_re, A_im,
                         L=int(L), TH=TH, TL=TL,
                         vmem_limit=vmem_limit, e_single_buf=e_single_buf)


# ---------------------------------------------------------------------------
# Pure-JAX reference (mirrors the PyTorch forward exactly)
# ---------------------------------------------------------------------------
def _reference(log_dt, C_re, C_im, log_A_re, A_im, L):
    dt = jnp.exp(log_dt)
    C = C_re.astype(jnp.complex64) + 1j * C_im.astype(jnp.complex64)
    A = (-jnp.exp(log_A_re)).astype(jnp.complex64) + 1j * A_im.astype(jnp.complex64)
    dtA = A * dt[:, None].astype(jnp.complex64)
    K = dtA[:, :, None] * jnp.arange(L, dtype=jnp.float32)
    Cp = C * (jnp.exp(dtA) - 1.0) / A
    return 2.0 * jnp.real(jnp.einsum("hn,hnl->hl", Cp, jnp.exp(K)))


if __name__ == "__main__":
    # Small config: model dim H = 16, state_dim N = 16 (so N/2 = 8), L = 256.
    H, N, L = 16, 16, 256
    N2 = N // 2

    key = jax.random.PRNGKey(0)
    k_dt, k_cre, k_cim, k_are = jax.random.split(key, 4)

    log_dt = (jax.random.uniform(k_dt, (H,), dtype=jnp.float32)
              * (np.log(0.1) - np.log(0.001)) + np.log(0.001))
    C_re = jax.random.normal(k_cre, (H, N2), dtype=jnp.float32)
    C_im = jax.random.normal(k_cim, (H, N2), dtype=jnp.float32)
    log_A_re = jax.random.normal(k_are, (H, N2), dtype=jnp.float32)
    A_im = jnp.ones((H, N2), dtype=jnp.float32)

    out = jax.block_until_ready(
        s4_conv_kernel(log_dt, C_re, C_im, log_A_re, A_im, L))
    ref = jax.block_until_ready(
        _reference(log_dt, C_re, C_im, log_A_re, A_im, L))

    assert out.shape == (H, L) and out.dtype == jnp.float32
    assert np.allclose(np.asarray(out), np.asarray(ref), rtol=2e-3, atol=2e-3), (
        "mismatch vs reference")
    print("KERNEL_OK")
</pallas_src>

<mosaic_0001>
module attributes {stable_mosaic.version = 11 : i64} {
  func.func @_s4_kernel(%arg0: i32, %arg1: i32, %arg2: memref<1x2x8x8xf32, #tpu.memory_space<vmem>>, %arg3: memref<2x8x8x256xf32, #tpu.memory_space<vmem>>, %arg4: memref<8x256xf32, #tpu.memory_space<vmem>>) attributes {dimension_semantics = [#tpu.dimension_semantics<parallel>, #tpu.dimension_semantics<parallel>], iteration_bounds = array<i64: 2, 1>, scalar_prefetch = 0 : i64, scratch_operands = 0 : i64, tpu.core_type = #tpu.core_type<tc>, window_params = [{transform_indices = @transform_0, window_bounds = array<i64: 1, 2, 8, 8>}, {transform_indices = @transform_1, window_bounds = array<i64: 2, 8, 8, 256>}, {transform_indices = @transform_2, window_bounds = array<i64: 8, 256>}]} {
    %c0 = arith.constant 0 : index
    %c0_0 = arith.constant 0 : index
    %c0_1 = arith.constant 0 : index
    %c0_2 = arith.constant 0 : index
    %0 = vector.load %arg2[%c0, %c0_0, %c0_1, %c0_2] : memref<1x2x8x8xf32, #tpu.memory_space<vmem>>, vector<1x1x8x8xf32>
    %1 = vector.shape_cast %0 : vector<1x1x8x8xf32> to vector<8x8xf32>
    %2 = vector.shape_cast %1 : vector<8x8xf32> to vector<8x8x1xf32>
    %c0_3 = arith.constant 0 : index
    %c1 = arith.constant 1 : index
    %c0_4 = arith.constant 0 : index
    %c0_5 = arith.constant 0 : index
    %3 = vector.load %arg2[%c0_3, %c1, %c0_4, %c0_5] : memref<1x2x8x8xf32, #tpu.memory_space<vmem>>, vector<1x1x8x8xf32>
    %4 = vector.shape_cast %3 : vector<1x1x8x8xf32> to vector<8x8xf32>
    %5 = vector.shape_cast %4 : vector<8x8xf32> to vector<8x8x1xf32>
    %c0_i32 = arith.constant 0 : i32
    %c256_i32 = arith.constant 256 : i32
    %6 = arith.muli %c0_i32, %c256_i32 : i32
    %7 = tpu.assume_multiple %6, 256 : i32
    %c0_6 = arith.constant 0 : index
    %c0_7 = arith.constant 0 : index
    %c0_8 = arith.constant 0 : index
    %8 = arith.index_cast %7 : i32 to index
    %9 = vector.load %arg3[%c0_6, %c0_7, %c0_8, %8] : memref<2x8x8x256xf32, #tpu.memory_space<vmem>>, vector<1x8x8x256xf32>
    %10 = vector.shape_cast %9 : vector<1x8x8x256xf32> to vector<8x8x256xf32>
    %c1_9 = arith.constant 1 : index
    %c0_10 = arith.constant 0 : index
    %c0_11 = arith.constant 0 : index
    %11 = arith.index_cast %7 : i32 to index
    %12 = vector.load %arg3[%c1_9, %c0_10, %c0_11, %11] : memref<2x8x8x256xf32, #tpu.memory_space<vmem>>, vector<1x8x8x256xf32>
    %13 = vector.shape_cast %12 : vector<1x8x8x256xf32> to vector<8x8x256xf32>
    %14 = vector.broadcast %2 : vector<8x8x1xf32> to vector<8x8x256xf32>
    %15 = arith.mulf %14, %10 : vector<8x8x256xf32>
    %16 = vector.broadcast %5 : vector<8x8x1xf32> to vector<8x8x256xf32>
    %17 = arith.mulf %16, %13 : vector<8x8x256xf32>
    %18 = arith.subf %15, %17 : vector<8x8x256xf32>
    %cst = arith.constant dense<0.000000e+00> : vector<8x256xf32>
    %19 = vector.multi_reduction <add>, %18, %cst [1] : vector<8x8x256xf32> to vector<8x256xf32>
    %c0_12 = arith.constant 0 : index
    %20 = arith.index_cast %7 : i32 to index
    %21 = vector.load %arg4[%c0_12, %20] : memref<8x256xf32, #tpu.memory_space<vmem>>, vector<8x256xf32>
    tpu.vector_store %arg4[%c0_12, %20], %19 {strides = array<i32>} : memref<8x256xf32, #tpu.memory_space<vmem>>, vector<8x256xf32>,
    %c1_i32 = arith.constant 1 : i32
    return
  }
  func.func @transform_0(%arg0: i32, %arg1: i32) -> (i32, i32, i32, i32) {
    %c0_i32 = arith.constant 0 : i32
    %c0_i32_0 = arith.constant 0 : i32
    %c0_i32_1 = arith.constant 0 : i32
    return %arg1, %c0_i32, %arg0, %c0_i32_0 : i32, i32, i32, i32
  }
  func.func @transform_1(%arg0: i32, %arg1: i32) -> (i32, i32, i32, i32) {
    %c0_i32 = arith.constant 0 : i32
    %c0_i32_0 = arith.constant 0 : i32
    %c0_i32_1 = arith.constant 0 : i32
    %c0_i32_2 = arith.constant 0 : i32
    return %c0_i32, %arg0, %c0_i32_0, %c0_i32_1 : i32, i32, i32, i32
  }
  func.func @transform_2(%arg0: i32, %arg1: i32) -> (i32, i32) {
    %c0_i32 = arith.constant 0 : i32
    return %arg0, %arg1 : i32, i32
  }
}

</mosaic_0001>

<bundles_post_ra>
// kernel: _s4_conv_impl.1
= control target key start
LH: loop header
LB: loop body
LE: loop exit
PB: predicated region body
PF: predicated region fallthrough
CT: control target
= control target key end

     0   :  { %7 = vsyncpa [#allocation5], 0  ;;  %s1189_s0 = inlined_call_operand.vmem [shape: f32[1,2,16,8], index: 0, kind: input, shape index: {}]   ;;  %s1190_s1 = inlined_call_operand.vmem [shape: f32[2,16,8,256], index: 1, kind: input, shape index: {}]   ;;  %s1191_s2 = inlined_call_operand.hbm [shape: f32[16,256], index: 2, kind: output, shape index: {}]  }
   0x1   :  { %9 = vsyncpa [#allocation5 + $0x1], 0  ;;  %s947_s9 = smov 0   ;;  %s949_s10 = smov 0  }
   0x2   :  { %s951_s11 = smov 0   ;;  %s953_s12 = smov 0  }
   0x3   :  { %s955_s13 = smov 0   ;;  %s957_s14 = smov 0  }
   0x4 LB: > { %s755_s15 = sadd.s32 4294967295, %s930_s14   ;;  %s756_s16 = sadd.s32 4294967294, %s930_s14   ;;  %s930_s14 = sphi %s957_s14, %s15_s14   ;;  %s926_s13 = sphi %s955_s13, %s1199_s13   ;;  %s922_s12 = sphi %s953_s12, %s1198_s12   ;;  %s918_s11 = sphi %s951_s11, %s1197_s11   ;;  %s914_s10 = sphi %s949_s10, %s1196_s10   ;;  %s910_s9 = sphi %s947_s9, %s1195_s9  }
   0x5   : > { %s27_s17 = sadd.s32 1, %s926_s13  ;;  %s36_s18 = sadd.s32 1, %s918_s11 }
   0x6   : > { %p29_p0 = scmp.ge.s32.totalorder %s27_s17, 2  ;;  %p43_p1 = scmp.ne.s32.totalorder %s918_s11, %s914_s10 }
   0x7   : > { %p44_p2 = scmp.eq.s32.totalorder %s930_s14, 0  ;;  %p101_p3 = scmp.eq.s32.totalorder %s755_s15, 1 }
   0x8   : > { %s1201_s17 = smov (%p29_p0, %s27_s17), 0  ;;  %p106_p6 = scmp.ne.s32.totalorder %s914_s10, %s910_s9 }
   0x9   : > { %p986_p4 = por %p44_p2, %p43_p1  ;;  %p990_p5 = por %p101_p3, %p43_p1 }
   0xa   : > { %s32_s21 = ssub.s32 %s926_s13, %s1201_s17  ;;  %p107_p8 = scmp.eq.s32.totalorder %s756_s16, 1 }
   0xb   : > { %p34_p7 = scmp.eq.s32.totalorder %s32_s21, 0  ;;  %p758_p10 = scmp.ge.s32.totalorder %s930_s14, 2 }
   0xc   : > { %p1001_p9 = por %p107_p8, %p106_p6 }
   0xd   : > { %s999_s22 = scalar_select %p34_p7, %s918_s11, %s36_s18  }
   0xe   : > { %123 = sbr.rel (%p758_p10) target bundleno = 61 (0x3d), region = 16 }
  0x13   : > { %126 = sbr.rel (!%p986_p4) target bundleno = 25 (0x19), region = 20  ;;  %s128_s24 = sand.u32 (%p986_p4), 1, %s918_s11  }
  0x14   : > { %s760_s25 = sshll.u32 (%p986_p4), %s926_s13, 3  ;;  %s759_s26 = sshll.u32 (%p986_p4), %s128_s24, 4 }
  0x15   : > { %s134_s29 = scalar_lea.vmem (%p986_p4), %s1189_s0, %s760_s25  ;;  %s130_s30 = scalar_lea.vmem (%p986_p4), [#allocation2], %s759_s26 }
  0x16   : > { %v165_v0 = vld [vmem:[%s134_s29] sm:$0xff] (%p986_p4)  ;;  %v167_v1 = vld [vmem:[%s134_s29 + $0x10] sm:$0xff] (%p986_p4) }
  0x17   : > { %166 = vst [vmem:[%s130_s30] sm:$0xff] (%p986_p4), %v165_v0 }
  0x18   : > { %168 = vst [vmem:[%s130_s30 + $0x8] sm:$0xff] %v167_v1 }
  0x19 PF: > { %174 = sbr.rel (!%p986_p4) target bundleno = 61 (0x3d), region = 58  ;;  %s176_s3 = sand.u32 (%p986_p4), 1, %s918_s11  }
  0x1a   : > { %s792_s4 = sshll.u32 (%p986_p4), %s926_s13, 7  ;;  %s761_s5 = sshll.u32 (%p986_p4), %s176_s3, 8 }
  0x1b   : > { %s1022_s8 = scalar_lea.vmem (%p986_p4), %s1190_s1, %s792_s4  ;;  %s1027_s15 = scalar_lea.vmem (%p986_p4), [#allocation3], %s761_s5 }
  0x1c   : > { %v195_v2 = vld [vmem:[%s1022_s8] sm:$0xff] (%p986_p4)  ;;  %v197_v3 = vld [vmem:[%s1022_s8 + $0x8] sm:$0xff] (%p986_p4)  ;;  %v199_v4 = vld [vmem:[%s1022_s8 + $0x10] sm:$0xff] (%p986_p4) }
  0x1d   : > { %196 = vst [vmem:[%s1027_s15] sm:$0xff] (%p986_p4), %v195_v2  ;;  %v201_v5 = vld [vmem:[%s1022_s8 + $0x18] sm:$0xff] (%p986_p4)  ;;  %v203_v6 = vld [vmem:[%s1022_s8 + $0x20] sm:$0xff] (%p986_p4)  ;;  %v205_v7 = vld [vmem:[%s1022_s8 + $0x28] sm:$0xff] (%p986_p4) }
  0x1e   : > { %198 = vst [vmem:[%s1027_s15 + $0x8] sm:$0xff] %v197_v3  ;;  %v207_v8 = vld [vmem:[%s1022_s8 + $0x30] sm:$0xff]  ;;  %v209_v9 = vld [vmem:[%s1022_s8 + $0x38] sm:$0xff]  ;;  %v211_v10 = vld [vmem:[%s1022_s8 + $0x40] sm:$0xff] }
  0x1f   : > { %200 = vst [vmem:[%s1027_s15 + $0x10] sm:$0xff] %v199_v4  ;;  %v213_v11 = vld [vmem:[%s1022_s8 + $0x48] sm:$0xff]  ;;  %v215_v12 = vld [vmem:[%s1022_s8 + $0x50] sm:$0xff]  ;;  %v217_v13 = vld [vmem:[%s1022_s8 + $0x58] sm:$0xff] }
  0x20   : > { %202 = vst [vmem:[%s1027_s15 + $0x18] sm:$0xff] %v201_v5  ;;  %v219_v14 = vld [vmem:[%s1022_s8 + $0x60] sm:$0xff]  ;;  %v221_v15 = vld [vmem:[%s1022_s8 + $0x68] sm:$0xff]  ;;  %v223_v16 = vld [vmem:[%s1022_s8 + $0x70] sm:$0xff] }
  0x21   : > { %204 = vst [vmem:[%s1027_s15 + $0x20] sm:$0xff] %v203_v6  ;;  %v225_v17 = vld [vmem:[%s1022_s8 + $0x78] sm:$0xff]  ;;  %v227_v18 = vld [vmem:[%s1022_s8 + $0x100] sm:$0xff]  ;;  %v229_v19 = vld [vmem:[%s1022_s8 + $0x108] sm:$0xff] }
  0x22   : > { %206 = vst [vmem:[%s1027_s15 + $0x28] sm:$0xff] %v205_v7  ;;  %v231_v20 = vld [vmem:[%s1022_s8 + $0x110] sm:$0xff]  ;;  %v233_v21 = vld [vmem:[%s1022_s8 + $0x118] sm:$0xff]  ;;  %v235_v22 = vld [vmem:[%s1022_s8 + $0x120] sm:$0xff] }
  0x23   : > { %208 = vst [vmem:[%s1027_s15 + $0x30] sm:$0xff] %v207_v8  ;;  %v237_v23 = vld [vmem:[%s1022_s8 + $0x128] sm:$0xff]  ;;  %v239_v24 = vld [vmem:[%s1022_s8 + $0x130] sm:$0xff]  ;;  %v241_v25 = vld [vmem:[%s1022_s8 + $0x138] sm:$0xff] }
  0x24   : > { %210 = vst [vmem:[%s1027_s15 + $0x38] sm:$0xff] %v209_v9  ;;  %v243_v26 = vld [vmem:[%s1022_s8 + $0x140] sm:$0xff]  ;;  %v245_v27 = vld [vmem:[%s1022_s8 + $0x148] sm:$0xff]  ;;  %v247_v28 = vld [vmem:[%s1022_s8 + $0x150] sm:$0xff] }
  0x25   : > { %212 = vst [vmem:[%s1027_s15 + $0x40] sm:$0xff] %v211_v10  ;;  %v249_v29 = vld [vmem:[%s1022_s8 + $0x158] sm:$0xff]  ;;  %v251_v30 = vld [vmem:[%s1022_s8 + $0x160] sm:$0xff]  ;;  %v253_v31 = vld [vmem:[%s1022_s8 + $0x168] sm:$0xff] }
  0x26   : > { %214 = vst [vmem:[%s1027_s15 + $0x48] sm:$0xff] %v213_v11  ;;  %v255_v32 = vld [vmem:[%s1022_s8 + $0x170] sm:$0xff]  ;;  %v257_v33 = vld [vmem:[%s1022_s8 + $0x178] sm:$0xff] }
  0x27   : > { %216 = vst [vmem:[%s1027_s15 + $0x50] sm:$0xff] %v215_v12 }
  0x28   : > { %218 = vst [vmem:[%s1027_s15 + $0x58] sm:$0xff] %v217_v13 }
  0x29   : > { %220 = vst [vmem:[%s1027_s15 + $0x60] sm:$0xff] %v219_v14 }
  0x2a   : > { %222 = vst [vmem:[%s1027_s15 + $0x68] sm:$0xff] %v221_v15 }
  0x2b   : > { %224 = vst [vmem:[%s1027_s15 + $0x70] sm:$0xff] %v223_v16 }
  0x2c   : > { %226 = vst [vmem:[%s1027_s15 + $0x78] sm:$0xff] %v225_v17 }
  0x2d   : > { %228 = vst [vmem:[%s1027_s15 + $0x80] sm:$0xff] %v227_v18 }
  0x2e   : > { %230 = vst [vmem:[%s1027_s15 + $0x88] sm:$0xff] %v229_v19 }
  0x2f   : > { %232 = vst [vmem:[%s1027_s15 + $0x90] sm:$0xff] %v231_v20 }
  0x30   : > { %234 = vst [vmem:[%s1027_s15 + $0x98] sm:$0xff] %v233_v21 }
  0x31   : > { %236 = vst [vmem:[%s1027_s15 + $0xa0] sm:$0xff] %v235_v22 }
  0x32   : > { %238 = vst [vmem:[%s1027_s15 + $0xa8] sm:$0xff] %v237_v23 }
  0x33   : > { %240 = vst [vmem:[%s1027_s15 + $0xb0] sm:$0xff] %v239_v24 }
  0x34   : > { %242 = vst [vmem:[%s1027_s15 + $0xb8] sm:$0xff] %v241_v25 }
  0x35   : > { %244 = vst [vmem:[%s1027_s15 + $0xc0] sm:$0xff] %v243_v26 }
  0x36   : > { %246 = vst [vmem:[%s1027_s15 + $0xc8] sm:$0xff] %v245_v27 }
  0x37   : > { %248 = vst [vmem:[%s1027_s15 + $0xd0] sm:$0xff] %v247_v28 }
  0x38   : > { %250 = vst [vmem:[%s1027_s15 + $0xd8] sm:$0xff] %v249_v29 }
  0x39   : > { %252 = vst [vmem:[%s1027_s15 + $0xe0] sm:$0xff] %v251_v30 }
  0x3a   : > { %254 = vst [vmem:[%s1027_s15 + $0xe8] sm:$0xff] %v253_v31 }
  0x3b   : > { %256 = vst [vmem:[%s1027_s15 + $0xf0] sm:$0xff] %v255_v32 }
  0x3c   : > { %258 = vst [vmem:[%s1027_s15 + $0xf8] sm:$0xff] %v257_v33 }
  0x3d PF: > { %p765_p11 = scmp.ge.s32.totalorder %s930_s14, 1  ;;  %p263_p12 = scmp.lt.s32.totalorder %s930_s14, 3 }
  0x3f   : > { %p264_p13 = pnand %p765_p11, %p263_p12 }
  0x40   : > { %s1093_s16 = sand.u32 (!%p264_p13), 1, %s914_s10   ;;  %s793_s25 = sshll.u32 (!%p264_p13), %s922_s12, 4 }
  0x41   : > { %267 = sbr.rel (%p264_p13) target bundleno = 259 (0x103), region = 81  ;;  %s766_s18 = sshll.u32 (!%p264_p13), %s1093_s16, 4 }
  0x42   : > { %s272_s19 = scalar_lea.vmem (!%p264_p13), [#allocation2], %s766_s18  ;;  %s767_s21 = sshll.u32 (!%p264_p13), %s1093_s16, 8 }
  0x43   : > { %s1101_s24 = scalar_lea.vmem (!%p264_p13), [#allocation3], %s767_s21  ;;  %s653_s28 = scalar_lea.hbm (!%p264_p13), %s1191_s2, %s793_s25 }
  0x44   : > { %s301_s12 = scalar_lea.vmem (!%p264_p13), [#allocation4], %s766_s18  ;;  %s657_s30 = sshll.u32 (!%p264_p13), %s653_s28, 4  ;;  %s658_s30 = int_to_ptr.hbm [resolvable:$true] %s657_s30 }
  0x45   : > { %s655_s29 = sshll.u32 (!%p264_p13), %s301_s12, 4  ;;  %s640_s3 = scalar_lea.sflag (!%p264_p13), [#allocation5], %s1093_s16  ;;  %s656_s29 = int_to_ptr.vmem [resolvable:$true] %s655_s29 }
  0x46   : > { %v306_v34 = vlaneseq  ;;  %v304_v36 = vld [vmem:[%s272_s19] sm:$0xff]  ;;  %v769_v43 = vld [vmem:[%s272_s19 + $0x8] sm:$0xff]  ;;  %vm614_vm0 = vcmask 1041409   ;;  %vm616_vm1 = vcmask 1042434   ;;  %vm618_vm2 = vcmask 1043459   ;;  %s866_s4 = sshra.s32 %s658_s30, 4  ;;  %s867_s4 = int_to_ptr.hbm [resolvable:$true] %s866_s4 }
  0x47   : > { %v333_v37 = vperm.slane %v304_v36, 4  ;;  %v319_v38 = vperm.slane %v304_v36, 2  ;;  %v305_v39 = vperm.slane %v304_v36, 0  ;;  %v340_v40 = vperm.slane %v304_v36, 5  ;;  %v429_v61 = vld [vmem:[%s1101_s24 + $0x50] sm:$0xff]  ;;  %v430_v62 = vld [vmem:[%s1101_s24 + $0x58] sm:$0xff]  ;;  %p873_p3 = scmp.lt.s32.totalorder %s867_s4, %s1191_s2 }
  0x48   : > { %v307_v35 = vshrl.u32 %v306_v34, 7  ;;  %v326_v41 = vperm.slane %v304_v36, 3  ;;  %v312_v42 = vperm.slane %v304_v36, 1  ;;  %v377_v44 = vperm.slane %v769_v43, 2  ;;  %v774_v63 = vld [vmem:[%s1101_s24 + $0xa0] sm:$0xff]  ;;  %v775_v0 = vld [vmem:[%s1101_s24 + $0xa8] sm:$0xff] }
  0x49   : > { %v370_v45 = vperm.slane %v769_v43, 1  ;;  %v363_v46 = vperm.slane %v769_v43, 0  ;;  %v398_v47 = vperm.slane %v769_v43, 5  ;;  %v391_v48 = vperm.slane %v769_v43, 4  ;;  %v780_v1 = vld [vmem:[%s1101_s24 + $0xd0] sm:$0xff]  ;;  %v781_v2 = vld [vmem:[%s1101_s24 + $0xd8] sm:$0xff] }
  0x4a   : > { %851 = vset.pattern.permute.xlu2 %v307_v35  ;;  %850 = vset.pattern.permute.xlu1 %v307_v35  ;;  %v384_v49 = vperm.slane %v769_v43, 3  ;;  %v354_v50 = vperm.slane %v304_v36, 7  ;;  %v405_v51 = vperm.slane %v769_v43, 6  ;;  %v347_v52 = vperm.slane %v304_v36, 6  ;;  %v423_v3 = vld [vmem:[%s1101_s24 + $0x20] sm:$0xff]  ;;  %v424_v4 = vld [vmem:[%s1101_s24 + $0x28] sm:$0xff] }
  0x4b   : > { %849 = vset.pattern.permute.xlu0 %v307_v35  ;;  %v412_v53 = vperm.slane %v769_v43, 7  ;;  %v419_v5 = vld [vmem:[%s1101_s24] sm:$0xff]  ;;  %v421_v6 = vld [vmem:[%s1101_s24 + $0x10] sm:$0xff]  ;;  %v422_v8 = vld [vmem:[%s1101_s24 + $0x18] sm:$0xff]  ;;  %vm620_vm3 = vcmask 1044484   ;;  %vm622_vm4 = vcmask 1045509  }
  0x4c   : > { %v772_v9 = vld [vmem:[%s1101_s24 + $0x90] sm:$0xff]  ;;  %v773_v10 = vld [vmem:[%s1101_s24 + $0x98] sm:$0xff]  ;;  %v420_v15 = vld [vmem:[%s1101_s24 + $0x8] sm:$0xff]  ;;  %vm624_vm5 = vcmask 1046534   ;;  %vm626_vm6 = vcmask 1047559   ;;  %s868_s5 = scalar_lea.hbm %s867_s4, 16 }
  0x4d   : > { %v770_v16 = vld [vmem:[%s1101_s24 + $0x80] sm:$0xff]  ;;  %v771_v17 = vld [vmem:[%s1101_s24 + $0x88] sm:$0xff]  ;;  %p869_p0 = scmp.ne.s32.totalorder %s867_s4, %s868_s5  ;;  %s872_s8 = scalar_lea.hbm %s1191_s2, 32 }
  0x4e   : > { %v427_v36 = vld [vmem:[%s1101_s24 + $0x40] sm:$0xff]  ;;  %p874_p4 = scmp.lt.s32.totalorder %s872_s8, %s868_s5 }
  0x4f   : > { %p870_p1 = pnand %p869_p0, %p990_p5 }
  0x50   : > { %p875_p6 = por %p874_p4, %p873_p3 }
  0x51   : > { %p871_p2 = pneg %p870_p1 }
  0x52   : > { %338 = vperm.xlu2 %851, %v333_v37   ;;  %324 = vperm.xlu1 %850, %v319_v38   ;;  %v428_v37 = vld [vmem:[%s1101_s24 + $0x48] sm:$0xff] }
  0x53   : > { %310 = vperm.xlu0 %849, %v305_v39   ;;  %p876_p7 = pnand %p875_p6, %p871_p2 }
  0x5a   : > { %345 = vperm.xlu2 %851, %v340_v40   ;;  %331 = vperm.xlu1 %850, %v326_v41  }
  0x5b   : > { %317 = vperm.xlu0 %849, %v312_v42  }
  0x62   : > { %382 = vperm.xlu2 %851, %v377_v44   ;;  %375 = vperm.xlu1 %850, %v370_v45   ;;  %v425_v44 = vld [vmem:[%s1101_s24 + $0x30] sm:$0xff] }
  0x63   : > { %368 = vperm.xlu0 %849, %v363_v46  }
  0x6a   : > { %403 = vperm.xlu2 %851, %v398_v47   ;;  %396 = vperm.xlu1 %850, %v391_v48   ;;  %v778_v47 = vld [vmem:[%s1101_s24 + $0xc0] sm:$0xff]  ;;  %v779_v48 = vld [vmem:[%s1101_s24 + $0xc8] sm:$0xff] }
  0x6b   : > { %389 = vperm.xlu0 %849, %v384_v49  }
  0x72   : > { %359 = vperm.xlu2 %851, %v354_v50   ;;  %410 = vperm.xlu1 %850, %v405_v51  }
  0x73   : > { %352 = vperm.xlu0 %849, %v347_v52  }
  0x7b   : > { %417 = vperm.xlu0 %849, %v412_v53   ;;  %v426_v53 = vld [vmem:[%s1101_s24 + $0x38] sm:$0xff] }
  0xac   : > { %v339_v54 = vpop.permute.xlu2 %338 }
  0xad   : > { %v462_v49 = vmul.f32 %v427_v36, %v339_v54  ;;  %v463_v50 = vmul.f32 %v428_v37, %v339_v54 }
  0xb4   : > { %v346_v55 = vpop.permute.xlu2 %345 }
  0xb5   : > { %v464_v11 = vmul.f32 %v429_v61, %v346_v55  ;;  %v465_v12 = vmul.f32 %v430_v62, %v346_v55  ;;  %v776_v55 = vld [vmem:[%s1101_s24 + $0xb0] sm:$0xff] }
  0xbc   : > { %v383_v58 = vpop.permute.xlu2 %382 }
  0xbd   : > { %v474_v18 = vmul.f32 %v774_v63, %v383_v58  ;;  %v475_v19 = vmul.f32 %v775_v0, %v383_v58 }
  0xc4   : > { %v325_v56 = vpop.permute.xlu1 %324  ;;  %v404_v7 = vpop.permute.xlu2 %403 }
  0xc5   : > { %v311_v57 = vpop.permute.xlu0 %310  ;;  %v480_v13 = vmul.f32 %v780_v1, %v404_v7  ;;  %v481_v14 = vmul.f32 %v781_v2, %v404_v7  ;;  %v458_v20 = vmul.f32 %v423_v3, %v325_v56  ;;  %v459_v21 = vmul.f32 %v424_v4, %v325_v56  ;;  %v777_v56 = vld [vmem:[%s1101_s24 + $0xb8] sm:$0xff] }
  0xc6   : > { %v454_v28 = vmul.f32 %v419_v5, %v311_v57  ;;  %v455_v29 = vmul.f32 %v420_v15, %v311_v57 }
  0xc7   : > { %v496_v32 = vsub.f32 %v464_v11, %v480_v13  ;;  %v497_v33 = vsub.f32 %v465_v12, %v481_v14  ;;  %v490_v38 = vsub.f32 %v458_v20, %v474_v18  ;;  %v491_v39 = vsub.f32 %v459_v21, %v475_v19 }
  0xc9   : > { %v562_v51 = vrot.slane %v496_v32, 4  ;;  %v568_v52 = vrot.slane %v497_v33, 4  ;;  %v526_v57 = vrot.slane %v490_v38, 4  ;;  %v532_v58 = vrot.slane %v491_v39, 4 }
  0xcb   : > { %v563_v7 = vadd.f32 %v562_v51, %v496_v32  ;;  %v527_v11 = vadd.f32 %v526_v57, %v490_v38  ;;  %v533_v12 = vadd.f32 %v532_v58, %v491_v39  ;;  %v431_v38 = vld [vmem:[%s1101_s24 + $0x60] sm:$0xff]  ;;  %v432_v39 = vld [vmem:[%s1101_s24 + $0x68] sm:$0xff] }
  0xcc   : > { %v1099_v59 = vpop.permute.xlu1 %331 }
  0xcd   : > { %v318_v60 = vpop.permute.xlu0 %317  ;;  %v460_v4 = vmul.f32 %v425_v44, %v1099_v59  ;;  %v461_v5 = vmul.f32 %v426_v53, %v1099_v59 }
  0xce   : > { %v456_v23 = vmul.f32 %v421_v6, %v318_v60  ;;  %v457_v24 = vmul.f32 %v422_v8, %v318_v60  ;;  %v569_v8 = vadd.f32 %v568_v52, %v497_v33 }
  0xd4   : > { %v376_v22 = vpop.permute.xlu1 %375 }
  0xd5   : > { %v472_v25 = vmul.f32 %v772_v9, %v376_v22  ;;  %v473_v26 = vmul.f32 %v773_v10, %v376_v22  ;;  %v369_v27 = vpop.permute.xlu0 %368  ;;  %v564_v22 = vrot.slane %v563_v7, 2 }
  0xd6   : > { %v470_v30 = vmul.f32 %v770_v16, %v369_v27  ;;  %v471_v31 = vmul.f32 %v771_v17, %v369_v27  ;;  %v534_v27 = vrot.slane %v533_v12, 2 }
  0xd7   : > { %v488_v34 = vsub.f32 %v456_v23, %v472_v25  ;;  %v489_v35 = vsub.f32 %v457_v24, %v473_v26  ;;  %v570_v23 = vrot.slane %v569_v8, 2  ;;  %v782_v24 = vld [vmem:[%s1101_s24 + $0xe0] sm:$0xff]  ;;  %v783_v25 = vld [vmem:[%s1101_s24 + $0xe8] sm:$0xff]  ;;  %v528_v26 = vrot.slane %v527_v11, 2 }
  0xd8   : > { %v486_v40 = vsub.f32 %v454_v28, %v470_v30  ;;  %v487_v41 = vsub.f32 %v455_v29, %v471_v31  ;;  %v433_v28 = vld [vmem:[%s1101_s24 + $0x70] sm:$0xff]  ;;  %v434_v29 = vld [vmem:[%s1101_s24 + $0x78] sm:$0xff]  ;;  %v360_v30 = vpop.permute.xlu2 %359 }
  0xd9   : > { %v514_v42 = vrot.slane %v488_v34, 4  ;;  %v520_v43 = vrot.slane %v489_v35, 4 }
  0xda   : > { %v502_v45 = vrot.slane %v486_v40, 4  ;;  %v508_v46 = vrot.slane %v487_v41, 4 }
  0xdb   : > { %v515_v60 = vadd.f32 %v514_v42, %v488_v34  ;;  %v521_v61 = vadd.f32 %v520_v43, %v489_v35 }
  0xdc   : > { %v397_v62 = vpop.permute.xlu1 %396  ;;  %v503_v63 = vadd.f32 %v502_v45, %v486_v40  ;;  %v509_v0 = vadd.f32 %v508_v46, %v487_v41  ;;  %v468_v45 = vmul.f32 %v433_v28, %v360_v30  ;;  %v469_v46 = vmul.f32 %v434_v29, %v360_v30 }
  0xdd   : > { %v478_v1 = vmul.f32 %v778_v47, %v397_v62  ;;  %v479_v2 = vmul.f32 %v779_v48, %v397_v62  ;;  %v390_v3 = vpop.permute.xlu0 %389  ;;  %v516_v15 = vrot.slane %v515_v60, 2  ;;  %v522_v16 = vrot.slane %v521_v61, 2 }
  0xde   : > { %v476_v54 = vmul.f32 %v776_v55, %v390_v3  ;;  %v477_v6 = vmul.f32 %v777_v56, %v390_v3  ;;  %v504_v17 = vrot.slane %v503_v63, 2  ;;  %v510_v18 = vrot.slane %v509_v0, 2 }
  0xdf   : > { %v494_v9 = vsub.f32 %v462_v49, %v478_v1  ;;  %v495_v10 = vsub.f32 %v463_v50, %v479_v2  ;;  %v517_v34 = vadd.f32 %v516_v15, %v515_v60  ;;  %v523_v35 = vadd.f32 %v522_v16, %v521_v61 }
  0xe0   : > { %v492_v13 = vsub.f32 %v460_v4, %v476_v54  ;;  %v493_v14 = vsub.f32 %v461_v5, %v477_v6  ;;  %v505_v36 = vadd.f32 %v504_v17, %v503_v63  ;;  %v511_v37 = vadd.f32 %v510_v18, %v509_v0  ;;  %v784_v6 = vld [vmem:[%s1101_s24 + $0xf0] sm:$0xff] }
  0xe1   : > { %v550_v19 = vrot.slane %v494_v9, 4  ;;  %v556_v59 = vrot.slane %v495_v10, 4  ;;  %v529_v49 = vadd.f32 %v528_v26, %v527_v11  ;;  %v535_v50 = vadd.f32 %v534_v27, %v533_v12 }
  0xe2   : > { %v538_v20 = vrot.slane %v492_v13, 4  ;;  %v544_v21 = vrot.slane %v493_v14, 4  ;;  %v518_v53 = vrot.slane %v517_v34, 1  ;;  %v524_v55 = vrot.slane %v523_v35, 1 }
  0xe3   : > { %v551_v41 = vadd.f32 %v550_v19, %v494_v9  ;;  %v557_v42 = vadd.f32 %v556_v59, %v495_v10  ;;  %v506_v56 = vrot.slane %v505_v36, 1  ;;  %v512_v57 = vrot.slane %v511_v37, 1  ;;  %v785_v9 = vld [vmem:[%s1101_s24 + $0xf8] sm:$0xff] }
  0xe4   : > { %v539_v31 = vadd.f32 %v538_v20, %v492_v13  ;;  %v545_v32 = vadd.f32 %v544_v21, %v493_v14  ;;  %v411_v33 = vpop.permute.xlu1 %410  ;;  %v565_v63 = vadd.f32 %v564_v22, %v563_v7  ;;  %v1135_v0 = vadd.f32 %v570_v23, %v569_v8 }
  0xe5   : > { %v353_v40 = vpop.permute.xlu0 %352  ;;  %v482_v43 = vmul.f32 %v782_v24, %v411_v33  ;;  %v483_v44 = vmul.f32 %v783_v25, %v411_v33  ;;  %v552_v58 = vrot.slane %v551_v41, 2  ;;  %v558_v60 = vrot.slane %v557_v42, 2 }
  0xe6   : > { %v540_v47 = vrot.slane %v539_v31, 2  ;;  %v546_v48 = vrot.slane %v545_v32, 2  ;;  %v466_v51 = vmul.f32 %v431_v38, %v353_v40  ;;  %v467_v52 = vmul.f32 %v432_v39, %v353_v40 }
  0xe7   : > { %v530_v3 = vrot.slane %v529_v49, 1  ;;  %v536_v4 = vrot.slane %v535_v50, 1  ;;  %v519_v10 = vadd.f32 %v518_v53, %v517_v34  ;;  %v525_v11 = vadd.f32 %v524_v55, %v523_v35 }
  0xe8   : > { %v498_v61 = vsub.f32 %v466_v51, %v482_v43  ;;  %v499_v62 = vsub.f32 %v467_v52, %v483_v44  ;;  %v541_v1 = vadd.f32 %v540_v47, %v539_v31  ;;  %v547_v2 = vadd.f32 %v546_v48, %v545_v32 }
  0xe9   : > { %v507_v12 = vadd.f32 %v506_v56, %v505_v36  ;;  %v513_v13 = vadd.f32 %v512_v57, %v511_v37  ;;  %v553_v15 = vadd.f32 %v552_v58, %v551_v41  ;;  %v559_v16 = vadd.f32 %v558_v60, %v557_v42 }
  0xea   : > { %v574_v5 = vrot.slane %v498_v61, 4  ;;  %v580_v54 = vrot.slane %v499_v62, 4  ;;  %v542_v7 = vrot.slane %v541_v1, 1  ;;  %v548_v8 = vrot.slane %v547_v2, 1 }
  0xeb   : > { %v531_v20 = vadd.f32 %v530_v3, %v529_v49  ;;  %v537_v21 = vadd.f32 %v536_v4, %v535_v50  ;;  %v615_v24 = vsel %vm614_vm0, %v519_v10, %v507_v12  ;;  %v628_v25 = vsel %vm614_vm0, %v525_v11, %v513_v13 }
  0xec   : > { %v575_v17 = vadd.f32 %v574_v5, %v498_v61  ;;  %v581_v18 = vadd.f32 %v580_v54, %v499_v62  ;;  %v554_v28 = vrot.slane %v553_v15, 1  ;;  %v560_v29 = vrot.slane %v559_v16, 1 }
  0xed   : > { %v418_v14 = vpop.permute.xlu0 %417  ;;  %v543_v32 = vadd.f32 %v542_v7, %v541_v1  ;;  %v549_v33 = vadd.f32 %v548_v8, %v547_v2  ;;  %v566_v36 = vrot.slane %v565_v63, 1  ;;  %v572_v37 = vrot.slane %v1135_v0, 1 }
  0xee   : > { %v484_v19 = vmul.f32 %v784_v6, %v418_v14  ;;  %v485_v59 = vmul.f32 %v785_v9, %v418_v14  ;;  %v576_v22 = vrot.slane %v575_v17, 2  ;;  %v582_v23 = vrot.slane %v581_v18, 2 }
  0xef   : > { %v617_v38 = vsel %vm616_vm1, %v531_v20, %v615_v24  ;;  %v629_v39 = vsel %vm616_vm1, %v537_v21, %v628_v25  ;;  %v555_v42 = vadd.f32 %v554_v28, %v553_v15  ;;  %v561_v43 = vadd.f32 %v560_v29, %v559_v16 }
  0xf0   : > { %v500_v26 = vsub.f32 %v468_v45, %v484_v19  ;;  %v501_v27 = vsub.f32 %v469_v46, %v485_v59  ;;  %v577_v30 = vadd.f32 %v576_v22, %v575_v17  ;;  %v583_v31 = vadd.f32 %v582_v23, %v581_v18 }
  0xf1   : > { %v619_v46 = vsel %vm618_vm2, %v543_v32, %v617_v38  ;;  %v630_v47 = vsel %vm618_vm2, %v549_v33, %v629_v39  ;;  %v567_v50 = vadd.f32 %v566_v36, %v565_v63  ;;  %v573_v58 = vadd.f32 %v572_v37, %v1135_v0 }
  0xf2   : > { %v586_v34 = vrot.slane %v500_v26, 4  ;;  %v592_v35 = vrot.slane %v501_v27, 4  ;;  %v578_v44 = vrot.slane %v577_v30, 1  ;;  %v584_v45 = vrot.slane %v583_v31, 1 }
  0xf3   : > { %v621_v56 = vsel %vm620_vm3, %v555_v42, %v619_v46  ;;  %v631_v57 = vsel %vm620_vm3, %v561_v43, %v630_v47 }
  0xf4   : > { %v587_v40 = vadd.f32 %v586_v34, %v500_v26  ;;  %v593_v41 = vadd.f32 %v592_v35, %v501_v27  ;;  %v579_v53 = vadd.f32 %v578_v44, %v577_v30  ;;  %v585_v55 = vadd.f32 %v584_v45, %v583_v31 }
  0xf5   : > { %v623_v1 = vsel %vm622_vm4, %v567_v50, %v621_v56  ;;  %v632_v2 = vsel %vm622_vm4, %v573_v58, %v631_v57 }
  0xf6   : > { %v588_v48 = vrot.slane %v587_v40, 2  ;;  %v594_v49 = vrot.slane %v593_v41, 2  ;;  %v625_v3 = vsel %vm624_vm5, %v579_v53, %v623_v1  ;;  %v633_v4 = vsel %vm624_vm5, %v585_v55, %v632_v2 }
  0xf8   : > { %v589_v51 = vadd.f32 %v588_v48, %v587_v40  ;;  %v595_v52 = vadd.f32 %v594_v49, %v593_v41 }
  0xfa   : > { %v590_v60 = vrot.slane %v589_v51, 1  ;;  %v596_v61 = vrot.slane %v595_v52, 1 }
  0xfc   : > { %v591_v62 = vadd.f32 %v590_v60, %v589_v51  ;;  %v597_v63 = vadd.f32 %v596_v61, %v595_v52 }
  0xfe   : > { %v627_v5 = vsel %vm626_vm6, %v591_v62, %v625_v3  ;;  %v634_v0 = vsel %vm626_vm6, %v597_v63, %v633_v4 }
  0xff   : > { %637 = vst [vmem:[%s301_s12] sm:$0xff] %v627_v5 }
 0x100   : > { %638 = vst [vmem:[%s301_s12 + $0x8] sm:$0xff] %v634_v0 }
 0x101   : > { %879 = shalt.err (!%p876_p7)
}
 0x102   : > { %794 = dma.vmem_to_hbm [thread:$0]  (%p990_p5), %s656_s29, 256, %s658_s30, %s640_s3  }
 0x103 PF: > { %s669_s16 = sand.u32 1, %s910_s9   ;;  %p797_p8 = pnand %p758_p10, %p1001_p9 }
 0x104   : > { %s670_s19 = scalar_lea.sflag [#allocation5], %s669_s16 }
 0x105   : > { %p798_p11 = pneg %p797_p8 }
 0x107   : > { %905 = dma.done.wait (%p798_p11), %s670_s19, 256  }
 0x108   : > { %907 = vsyncadd (%p798_p11), %s670_s19, 4294967040  ;;  %s15_s14 = sadd.s32 1, %s930_s14   ;;  %s1195_s9 = smov %s914_s10 }
 0x109   : > { %p12_p12 = scmp.ge.s32.totalorder %s15_s14, 4   ;;  %s1196_s10 = smov %s918_s11 }
 0x10a   : > { %s1197_s11 = smov %s999_s22  ;;  %s1198_s12 = smov %s926_s13 }
 0x10b   : > { %s1199_s13 = smov %s1201_s17  ;;  %14 = sbr.rel (!%p12_p12) target bundleno = 4 (0x4), region = 139 }
 0x110   :  { %676 = vsyncpa [#allocation5], 1 }
 0x111   :  { %678 = vsyncpa [#allocation5 + $0x1], 1 }

</bundles_post_ra>
